<compile_context>
chip_gen: v5e
topology: v5e:2x2
jax: 0.10.0
libtpu: 0.0.40
codegen_flags: <defaults>
</compile_context>

<pallas_src>
import jax
import jax.numpy as jnp
from jax.experimental import pallas as pl
from jax.experimental.pallas import tpu as pltpu


def _round_up(x, m):
    return ((x + m - 1) // m) * m


_TM_MAX = 512  # rows per block; per-step VMEM ~ 2*TM*(K_PAD*2B + COUT_PAD*4B) ~ 0.6 MB


def _gemm_kernel(p_ref, w_ref, o_ref):
    # p_ref: (TM, K_PAD)        bf16 im2col patches block (bias column folded in)
    # w_ref: (K_PAD, COUT_PAD)  bf16 folded weight (+ bias row), resident across grid
    # o_ref: (TM, COUT_PAD)     f32 output block -- lane-dense (128 lanes)
    o_ref[...] = jnp.dot(
        p_ref[...], w_ref[...], preferred_element_type=jnp.float32
    ).astype(o_ref.dtype)


def conv2d_pallas(x_nchw, weight, bias):
    """Conv2d, stride=1, no padding. Matches nn.Conv2d(3, 64, 3).forward.

    x_nchw: (N, Cin, H, W) float32
    weight: (Cout, Cin, KH, KW) float32   (PyTorch OIHW layout)
    bias:   (Cout,) float32
    returns (N, Cout, OH, OW) float32
    """
    n, cin, h, w = x_nchw.shape
    cout, cin_w, kh, kw = weight.shape
    assert cin == cin_w
    oh, ow = h - kh + 1, w - kw + 1
    m = n * oh * ow
    k = kh * kw * cin

    # ---- tiling / padding parameters ----
    cout_pad = _round_up(cout, 128)       # 64 -> 128: unmasked full-lane stores
    k_pad = _round_up(k + 1, 32)          # 27 taps + 1 bias column -> 32
    tm = min(_round_up(m, 16), _TM_MAX)   # sublane-aligned (bf16) fixed row tile
    grid_m = pl.cdiv(m, tm)               # 1 block here; >=2 blocks for large M (v7x)
    m_pad = grid_m * tm

    # ---- wrapper-side im2col (plain XLA slices; fused by the compiler) ----
    x_nhwc = jnp.transpose(x_nchw, (0, 2, 3, 1)).astype(jnp.bfloat16)   # (N, H, W, Cin)
    taps = [x_nhwc[:, i:i + oh, j:j + ow, :]
            for i in range(kh) for j in range(kw)]                       # (i, j, c) order
    taps.append(jnp.ones((n, oh, ow, 1), jnp.bfloat16))                  # bias column
    taps.append(jnp.zeros((n, oh, ow, k_pad - k - 1), jnp.bfloat16))     # K zero-padding
    patches = jnp.concatenate(taps, axis=-1).reshape(m, k_pad)           # (M, K_PAD)
    if m_pad > m:
        patches = jnp.pad(patches, ((0, m_pad - m), (0, 0)))             # zero M rows

    # Folded weight with the same (i, j, c) row ordering; bias folded into row k.
    w_folded = jnp.transpose(weight, (2, 3, 1, 0)).reshape(k, cout)      # (K, Cout)
    w_mat = jnp.zeros((k_pad, cout_pad), jnp.bfloat16)
    w_mat = w_mat.at[:k, :cout].set(w_folded.astype(jnp.bfloat16))
    w_mat = w_mat.at[k, :cout].set(bias.astype(jnp.bfloat16))

    out_pad = pl.pallas_call(
        _gemm_kernel,
        out_shape=jax.ShapeDtypeStruct((m_pad, cout_pad), jnp.float32),
        grid_spec=pltpu.PrefetchScalarGridSpec(
            num_scalar_prefetch=0,
            grid=(grid_m,),
            in_specs=[
                pl.BlockSpec((tm, k_pad), lambda i: (i, 0)),
                pl.BlockSpec((k_pad, cout_pad), lambda i: (0, 0)),
            ],
            out_specs=pl.BlockSpec((tm, cout_pad), lambda i: (i, 0)),
        ),
        compiler_params=pltpu.CompilerParams(
            dimension_semantics=("parallel",),
        ),
    )(patches, w_mat)

    # Un-pad, un-flatten, back to NCHW (cheap on the small conv output).
    out = out_pad[:m, :cout].reshape(n, oh, ow, cout)
    return jnp.transpose(out, (0, 3, 1, 2)).astype(x_nchw.dtype)         # (N, Cout, OH, OW)


if __name__ == "__main__":
    key = jax.random.PRNGKey(0)
    kx, kw_, kb = jax.random.split(key, 3)

    # Net.__init__: nn.Conv2d(3, 64, 3) -> weight (64, 3, 3, 3), bias (64,)
    N, CIN, H, W = 2, 3, 16, 16
    COUT, KH, KW = 64, 3, 3

    x = jax.random.normal(kx, (N, CIN, H, W), dtype=jnp.float32)
    # Deterministic synthetic init (uniform, roughly PyTorch's fan-in scale).
    fan_in = CIN * KH * KW
    bound = 1.0 / (fan_in ** 0.5)
    weight = jax.random.uniform(
        kw_, (COUT, CIN, KH, KW), minval=-bound, maxval=bound, dtype=jnp.float32
    )
    bias = jax.random.uniform(
        kb, (COUT,), minval=-bound, maxval=bound, dtype=jnp.float32
    )

    out = jax.jit(conv2d_pallas)(x, weight, bias)
    out = jax.block_until_ready(out)

    # Sanity check against XLA's conv (not part of the kernel hot path).
    # Tolerance loosened vs the pure-f32 version because the MXU inputs are bf16
    # (f32 accumulate); layout bugs would show up as O(1) errors, not O(1e-2).
    ref = jax.lax.conv_general_dilated(
        x, weight, window_strides=(1, 1), padding="VALID",
        dimension_numbers=("NCHW", "OIHW", "NCHW"),
    ) + bias.reshape(1, COUT, 1, 1)
    assert out.shape == (N, COUT, H - KH + 1, W - KW + 1)
    assert jnp.allclose(out, ref, atol=2e-2, rtol=2e-2)

    print("KERNEL_OK")
</pallas_src>

<mosaic_0001>
module attributes {stable_mosaic.version = 11 : i64} {
  func.func @_gemm_kernel(%arg0: i32, %arg1: memref<400x32xbf16, #tpu.memory_space<vmem>>, %arg2: memref<32x128xbf16, #tpu.memory_space<vmem>>, %arg3: memref<400x128xf32, #tpu.memory_space<vmem>>) attributes {dimension_semantics = [#tpu.dimension_semantics<parallel>], iteration_bounds = array<i64: 1>, scalar_prefetch = 0 : i64, scratch_operands = 0 : i64, tpu.core_type = #tpu.core_type<tc>, window_params = [{transform_indices = @transform_0, window_bounds = array<i64: 400, 32>}, {pipeline_mode = #tpu.pipeline_mode<synchronous>, transform_indices = @transform_1, window_bounds = array<i64: 32, 128>}, {transform_indices = @transform_2, window_bounds = array<i64: 400, 128>}]} {
    %c0 = arith.constant 0 : index
    %c0_0 = arith.constant 0 : index
    %0 = vector.load %arg1[%c0, %c0_0] : memref<400x32xbf16, #tpu.memory_space<vmem>>, vector<400x32xbf16>
    %c0_1 = arith.constant 0 : index
    %c0_2 = arith.constant 0 : index
    %1 = vector.load %arg2[%c0_1, %c0_2] : memref<32x128xbf16, #tpu.memory_space<vmem>>, vector<32x128xbf16>
    %cst = arith.constant dense<0.000000e+00> : vector<400x128xf32>
    %2 = tpu.matmul %0, %1, %cst {dimension_numbers = #tpu.dot_dimension_numbers<[1], [0], [0], [1], [0, 0, 1, 1], [], []>} : vector<400x32xbf16>, vector<32x128xbf16>, vector<400x128xf32> -> vector<400x128xf32>
    %c0_3 = arith.constant 0 : index
    %c0_4 = arith.constant 0 : index
    %3 = vector.load %arg3[%c0_3, %c0_4] : memref<400x128xf32, #tpu.memory_space<vmem>>, vector<400x128xf32>
    tpu.vector_store %arg3[%c0_3, %c0_4], %2 {strides = array<i32>} : memref<400x128xf32, #tpu.memory_space<vmem>>, vector<400x128xf32>,
    return
  }
  func.func @transform_0(%arg0: i32) -> (i32, i32) {
    %c0_i32 = arith.constant 0 : i32
    %c0_i32_0 = arith.constant 0 : i32
    return %arg0, %c0_i32 : i32, i32
  }
  func.func @transform_1(%arg0: i32) -> (i32, i32) {
    %c0_i32 = arith.constant 0 : i32
    %c0_i32_0 = arith.constant 0 : i32
    %c0_i32_1 = arith.constant 0 : i32
    return %c0_i32, %c0_i32_0 : i32, i32
  }
  func.func @transform_2(%arg0: i32) -> (i32, i32) {
    %c0_i32 = arith.constant 0 : i32
    %c0_i32_0 = arith.constant 0 : i32
    return %arg0, %c0_i32 : i32, i32
  }
}

</mosaic_0001>

<bundles_post_ra>
// kernel: conv2d_pallas.1
= control target key start
LH: loop header
LB: loop body
LE: loop exit
PB: predicated region body
PF: predicated region fallthrough
CT: control target
= control target key end

     0   :  { %vm203_vm0 = vcmask 261120   ;;  %s904_s1 = inlined_call_operand.vmem [shape: bf16[32,128], index: 1, kind: input, shape index: {}]   ;;  %s905_s0 = inlined_call_operand.vmem [shape: bf16[400,32], index: 0, kind: input, shape index: {}]   ;;  %s906_s2 = inlined_call_operand.vmem [shape: f32[400,128], index: 2, kind: output, shape index: {}]  }
   0x1   :  { %v626_v0 = vld [vmem:[%s904_s1 + $0x8] sm:$0xff]  ;;  %v625_v1 = vld [vmem:[%s904_s1] sm:$0xff]  ;;  %v606_v2 = vld [vmem:[%s905_s0 + $0x30] sm:$0xff] }
   0x2   :  { %627 = vmatpush.bf16.msra.mxu1 %v626_v0  ;;  %628 = vmatpush.bf16.msra.mxu2 %v626_v0  ;;  %v613_v3 = vld [vmem:[%s905_s0 + $0x68] sm:$0xff]  ;;  %v600_v4 = vld [vmem:[%s905_s0] sm:$0xff]  ;;  %v607_v6 = vld [vmem:[%s905_s0 + $0x38] sm:$0xff] }
   0x3   :  { %285 = vmatpush.bf16.msra.mxu0 %v626_v0  ;;  %629 = vmatpush.bf16.msra.mxu3 %v626_v0  ;;  %v620_v5 = vld [vmem:[%s905_s0 + $0xa0] sm:$0xff]  ;;  %v614_v7 = vld [vmem:[%s905_s0 + $0x70] sm:$0xff]  ;;  %v601_v8 = vld [vmem:[%s905_s0 + $0x8] sm:$0xff] }
   0x4   :  { %v621_v9 = vld [vmem:[%s905_s0 + $0xa8] sm:$0xff]  ;;  %v608_v10 = vld [vmem:[%s905_s0 + $0x40] sm:$0xff]  ;;  %v615_v11 = vld [vmem:[%s905_s0 + $0x78] sm:$0xff] }
   0x5   :  { %v602_v12 = vld [vmem:[%s905_s0 + $0x10] sm:$0xff]  ;;  %v609_v14 = vld [vmem:[%s905_s0 + $0x48] sm:$0xff]  ;;  %v616_v15 = vld [vmem:[%s905_s0 + $0x80] sm:$0xff] }
   0x6   :  { %630 = vmatpush.bf16.msra.mxu1 %v625_v1  ;;  %631 = vmatpush.bf16.msra.mxu2 %v625_v1  ;;  %v622_v13 = vld [vmem:[%s905_s0 + $0xb0] sm:$0xff]  ;;  %v603_v16 = vld [vmem:[%s905_s0 + $0x18] sm:$0xff]  ;;  %v617_v19 = vld [vmem:[%s905_s0 + $0x88] sm:$0xff] }
   0x7   :  { %286 = vmatpush.bf16.msra.mxu0 %v625_v1  ;;  %632 = vmatpush.bf16.msra.mxu3 %v625_v1  ;;  %v623_v17 = vld [vmem:[%s905_s0 + $0xb8] sm:$0xff]  ;;  %v610_v18 = vld [vmem:[%s905_s0 + $0x50] sm:$0xff]  ;;  %v604_v20 = vld [vmem:[%s905_s0 + $0x20] sm:$0xff] }
   0x8   :  { %v624_v21 = vld [vmem:[%s905_s0 + $0xc0] sm:$0xff]  ;;  %v611_v22 = vld [vmem:[%s905_s0 + $0x58] sm:$0xff]  ;;  %v618_v23 = vld [vmem:[%s905_s0 + $0x90] sm:$0xff] }
   0x9   :  { %581 = vmatmul.msk.bf16.vlgmr.msra.gmra.mxu1 %vm203_vm0, %v606_v2  ;;  %588 = vmatmul.msk.bf16.vlgmr.msra.gmra.mxu2 %vm203_vm0, %v613_v3  ;;  %v605_v24 = vld [vmem:[%s905_s0 + $0x28] sm:$0xff]  ;;  %v612_v25 = vld [vmem:[%s905_s0 + $0x60] sm:$0xff]  ;;  %v619_v26 = vld [vmem:[%s905_s0 + $0x98] sm:$0xff] }
   0xa   :  { %575 = vmatmul.msk.bf16.vlgmr.msra.gmra.mxu0 %vm203_vm0, %v600_v4  ;;  %595 = vmatmul.msk.bf16.vlgmr.msra.gmra.mxu3 %vm203_vm0, %v620_v5 }
  0x19   :  { %582 = vmatmul.msk.bf16.gmra.mxu1 %vm203_vm0, %v607_v6  ;;  %589 = vmatmul.msk.bf16.gmra.mxu2 %vm203_vm0, %v614_v7 }
  0x1a   :  { %576 = vmatmul.msk.bf16.gmra.mxu0 %vm203_vm0, %v601_v8  ;;  %596 = vmatmul.msk.bf16.gmra.mxu3 %vm203_vm0, %v621_v9 }
  0x29   :  { %583 = vmatmul.msk.bf16.gmra.mxu1 %vm203_vm0, %v608_v10  ;;  %590 = vmatmul.msk.bf16.gmra.mxu2 %vm203_vm0, %v615_v11 }
  0x2a   :  { %577 = vmatmul.msk.bf16.gmra.mxu0 %vm203_vm0, %v602_v12  ;;  %597 = vmatmul.msk.bf16.gmra.mxu3 %vm203_vm0, %v622_v13 }
  0x39   :  { %584 = vmatmul.msk.bf16.gmra.mxu1 %vm203_vm0, %v609_v14  ;;  %591 = vmatmul.msk.bf16.gmra.mxu2 %vm203_vm0, %v616_v15 }
  0x3a   :  { %578 = vmatmul.msk.bf16.gmra.mxu0 %vm203_vm0, %v603_v16  ;;  %598 = vmatmul.msk.bf16.gmra.mxu3 %vm203_vm0, %v623_v17 }
  0x49   :  { %585 = vmatmul.msk.bf16.gmra.mxu1 %vm203_vm0, %v610_v18  ;;  %592 = vmatmul.msk.bf16.gmra.mxu2 %vm203_vm0, %v617_v19 }
  0x4a   :  { %579 = vmatmul.msk.bf16.gmra.mxu0 %vm203_vm0, %v604_v20  ;;  %599 = vmatmul.msk.bf16.gmra.mxu3 %vm203_vm0, %v624_v21 }
  0x59   :  { %586 = vmatmul.msk.bf16.gmra.mxu1 %vm203_vm0, %v611_v22  ;;  %593 = vmatmul.msk.bf16.gmra.mxu2 %vm203_vm0, %v618_v23 }
  0x5a   :  { %580 = vmatmul.msk.bf16.gmra.mxu0 %vm203_vm0, %v605_v24 }
  0x69   :  { %587 = vmatmul.msk.bf16.gmra.mxu1 %vm203_vm0, %v612_v25  ;;  %594 = vmatmul.msk.bf16.gmra.mxu2 %vm203_vm0, %v619_v26 }
  0x86   :  { %v318_v27 = vpop.f32.mrf.mxu1 }
  0x87   :  { %425 = vst [vmem:[%s906_s2 + $0x60] sm:$0xff] %v318_v27  ;;  %v288_v28 = vpop.f32.mrf.mxu0 }
  0x88   :  { %413 = vst [vmem:[%s906_s2] sm:$0xff] %v288_v28 }
  0x8c   :  { %v353_v29 = vpop.f32.mrf.mxu2 }
  0x8d   :  { %439 = vst [vmem:[%s906_s2 + $0xd0] sm:$0xff] %v353_v29  ;;  %v388_v30 = vpop.f32.mrf.mxu3 }
  0x8e   :  { %v320_v31 = vpop.f32.mrf.mxu1  ;;  %453 = vst [vmem:[%s906_s2 + $0x140] sm:$0xff] %v388_v30 }
  0x8f   :  { %426 = vst [vmem:[%s906_s2 + $0x68] sm:$0xff] %v320_v31  ;;  %v290_v32 = vpop.f32.mrf.mxu0 }
  0x90   :  { %414 = vst [vmem:[%s906_s2 + $0x8] sm:$0xff] %v290_v32 }
  0x94   :  { %v355_v33 = vpop.f32.mrf.mxu2 }
  0x95   :  { %440 = vst [vmem:[%s906_s2 + $0xd8] sm:$0xff] %v355_v33  ;;  %v390_v34 = vpop.f32.mrf.mxu3 }
  0x96   :  { %v323_v35 = vpop.f32.mrf.mxu1  ;;  %454 = vst [vmem:[%s906_s2 + $0x148] sm:$0xff] %v390_v34 }
  0x97   :  { %427 = vst [vmem:[%s906_s2 + $0x70] sm:$0xff] %v323_v35  ;;  %v293_v36 = vpop.f32.mrf.mxu0 }
  0x98   :  { %415 = vst [vmem:[%s906_s2 + $0x10] sm:$0xff] %v293_v36 }
  0x9c   :  { %v358_v37 = vpop.f32.mrf.mxu2 }
  0x9d   :  { %441 = vst [vmem:[%s906_s2 + $0xe0] sm:$0xff] %v358_v37  ;;  %v393_v38 = vpop.f32.mrf.mxu3 }
  0x9e   :  { %v325_v39 = vpop.f32.mrf.mxu1  ;;  %455 = vst [vmem:[%s906_s2 + $0x150] sm:$0xff] %v393_v38 }
  0x9f   :  { %428 = vst [vmem:[%s906_s2 + $0x78] sm:$0xff] %v325_v39  ;;  %v295_v40 = vpop.f32.mrf.mxu0 }
  0xa0   :  { %416 = vst [vmem:[%s906_s2 + $0x18] sm:$0xff] %v295_v40 }
  0xa4   :  { %v360_v41 = vpop.f32.mrf.mxu2 }
  0xa5   :  { %442 = vst [vmem:[%s906_s2 + $0xe8] sm:$0xff] %v360_v41  ;;  %v395_v42 = vpop.f32.mrf.mxu3 }
  0xa6   :  { %v328_v43 = vpop.f32.mrf.mxu1  ;;  %456 = vst [vmem:[%s906_s2 + $0x158] sm:$0xff] %v395_v42 }
  0xa7   :  { %429 = vst [vmem:[%s906_s2 + $0x80] sm:$0xff] %v328_v43  ;;  %v298_v44 = vpop.f32.mrf.mxu0 }
  0xa8   :  { %417 = vst [vmem:[%s906_s2 + $0x20] sm:$0xff] %v298_v44 }
  0xac   :  { %v363_v45 = vpop.f32.mrf.mxu2 }
  0xad   :  { %443 = vst [vmem:[%s906_s2 + $0xf0] sm:$0xff] %v363_v45  ;;  %v398_v46 = vpop.f32.mrf.mxu3 }
  0xae   :  { %v330_v47 = vpop.f32.mrf.mxu1  ;;  %457 = vst [vmem:[%s906_s2 + $0x160] sm:$0xff] %v398_v46 }
  0xaf   :  { %430 = vst [vmem:[%s906_s2 + $0x88] sm:$0xff] %v330_v47  ;;  %v300_v48 = vpop.f32.mrf.mxu0 }
  0xb0   :  { %418 = vst [vmem:[%s906_s2 + $0x28] sm:$0xff] %v300_v48 }
  0xb4   :  { %v365_v49 = vpop.f32.mrf.mxu2 }
  0xb5   :  { %444 = vst [vmem:[%s906_s2 + $0xf8] sm:$0xff] %v365_v49  ;;  %v400_v50 = vpop.f32.mrf.mxu3 }
  0xb6   :  { %v333_v51 = vpop.f32.mrf.mxu1  ;;  %458 = vst [vmem:[%s906_s2 + $0x168] sm:$0xff] %v400_v50 }
  0xb7   :  { %431 = vst [vmem:[%s906_s2 + $0x90] sm:$0xff] %v333_v51  ;;  %v303_v52 = vpop.f32.mrf.mxu0 }
  0xb8   :  { %419 = vst [vmem:[%s906_s2 + $0x30] sm:$0xff] %v303_v52 }
  0xbc   :  { %v368_v53 = vpop.f32.mrf.mxu2 }
  0xbd   :  { %445 = vst [vmem:[%s906_s2 + $0x100] sm:$0xff] %v368_v53  ;;  %v403_v54 = vpop.f32.mrf.mxu3 }
  0xbe   :  { %v335_v55 = vpop.f32.mrf.mxu1  ;;  %459 = vst [vmem:[%s906_s2 + $0x170] sm:$0xff] %v403_v54 }
  0xbf   :  { %432 = vst [vmem:[%s906_s2 + $0x98] sm:$0xff] %v335_v55  ;;  %v305_v56 = vpop.f32.mrf.mxu0 }
  0xc0   :  { %420 = vst [vmem:[%s906_s2 + $0x38] sm:$0xff] %v305_v56 }
  0xc4   :  { %v370_v57 = vpop.f32.mrf.mxu2 }
  0xc5   :  { %446 = vst [vmem:[%s906_s2 + $0x108] sm:$0xff] %v370_v57  ;;  %v405_v58 = vpop.f32.mrf.mxu3 }
  0xc6   :  { %v338_v59 = vpop.f32.mrf.mxu1  ;;  %460 = vst [vmem:[%s906_s2 + $0x178] sm:$0xff] %v405_v58 }
  0xc7   :  { %433 = vst [vmem:[%s906_s2 + $0xa0] sm:$0xff] %v338_v59  ;;  %v308_v60 = vpop.f32.mrf.mxu0 }
  0xc8   :  { %421 = vst [vmem:[%s906_s2 + $0x40] sm:$0xff] %v308_v60 }
  0xcc   :  { %v373_v61 = vpop.f32.mrf.mxu2 }
  0xcd   :  { %447 = vst [vmem:[%s906_s2 + $0x110] sm:$0xff] %v373_v61  ;;  %v408_v62 = vpop.f32.mrf.mxu3 }
  0xce   :  { %v340_v63 = vpop.f32.mrf.mxu1  ;;  %461 = vst [vmem:[%s906_s2 + $0x180] sm:$0xff] %v408_v62 }
  0xcf   :  { %434 = vst [vmem:[%s906_s2 + $0xa8] sm:$0xff] %v340_v63  ;;  %v310_v0 = vpop.f32.mrf.mxu0 }
  0xd0   :  { %422 = vst [vmem:[%s906_s2 + $0x48] sm:$0xff] %v310_v0 }
  0xd4   :  { %v375_v1 = vpop.f32.mrf.mxu2 }
  0xd5   :  { %448 = vst [vmem:[%s906_s2 + $0x118] sm:$0xff] %v375_v1  ;;  %v410_v2 = vpop.f32.mrf.mxu3 }
  0xd6   :  { %v343_v3 = vpop.f32.mrf.mxu1  ;;  %462 = vst [vmem:[%s906_s2 + $0x188] sm:$0xff] %v410_v2 }
  0xd7   :  { %435 = vst [vmem:[%s906_s2 + $0xb0] sm:$0xff] %v343_v3  ;;  %v313_v4 = vpop.f32.mrf.mxu0 }
  0xd8   :  { %423 = vst [vmem:[%s906_s2 + $0x50] sm:$0xff] %v313_v4 }
  0xdc   :  { %v378_v5 = vpop.f32.mrf.mxu2 }
  0xdd   :  { %449 = vst [vmem:[%s906_s2 + $0x120] sm:$0xff] %v378_v5 }
  0xde   :  { %v345_v6 = vpop.f32.mrf.mxu1 }
  0xdf   :  { %436 = vst [vmem:[%s906_s2 + $0xb8] sm:$0xff] %v345_v6  ;;  %v315_v7 = vpop.f32.mrf.mxu0 }
  0xe0   :  { %424 = vst [vmem:[%s906_s2 + $0x58] sm:$0xff] %v315_v7 }
  0xe4   :  { %v380_v8 = vpop.f32.mrf.mxu2 }
  0xe5   :  { %450 = vst [vmem:[%s906_s2 + $0x128] sm:$0xff] %v380_v8 }
  0xe6   :  { %v348_v9 = vpop.f32.mrf.mxu1 }
  0xe7   :  { %437 = vst [vmem:[%s906_s2 + $0xc0] sm:$0xff] %v348_v9 }
  0xec   :  { %v383_v10 = vpop.f32.mrf.mxu2 }
  0xed   :  { %451 = vst [vmem:[%s906_s2 + $0x130] sm:$0xff] %v383_v10 }
  0xee   :  { %v350_v11 = vpop.f32.mrf.mxu1 }
  0xef   :  { %438 = vst [vmem:[%s906_s2 + $0xc8] sm:$0xff] %v350_v11 }
  0xf4   :  { %v385_v12 = vpop.f32.mrf.mxu2 }
  0xf5   :  { %452 = vst [vmem:[%s906_s2 + $0x138] sm:$0xff] %v385_v12 }

</bundles_post_ra>
